<compile_context>
chip_gen: v7x
topology: tpu7x:2x2x1
jax: 0.10.0
libtpu: 0.0.40
codegen_flags: <defaults>
</compile_context>

<pallas_src>
import functools

import jax
import jax.numpy as jnp
from jax.experimental import pallas as pl
from jax.experimental.pallas import tpu as pltpu

_TARGET_BLOCK_BYTES = 2 << 20  # ~2 MiB per block -> <=8 MiB live with double
                               # buffering; fits default scoped VMEM on
                               # v5e (16 MiB), v6e (32 MiB), v7x (32 MiB).


def _neg_scale_kernel(neg_coeff_ref, g_ref, o_ref):
    # grad_input = (-coeff) * grad_output
    # neg_coeff is already negated (scalar ALU work done once in the wrapper);
    # multiply in f32 so coeff is not quantized for low-precision gradients.
    nc = neg_coeff_ref[0]  # f32 scalar from SMEM
    o_ref[...] = (g_ref[...].astype(jnp.float32) * nc).astype(o_ref.dtype)


def _fold_2d(shape):
    """Pick a metadata-only 2-D view (rows, cols) of a contiguous array.

    Prefers a lane-dense cols (large multiple of 128) that divides the total
    size exactly so the reshape stays a bitcast; falls back to using the last
    dim as cols (also metadata-only)."""
    if len(shape) == 0:
        return 1, 1
    n = 1
    for d in shape:
        n *= d
    if n == 0:
        return 0, 1
    for cols in (2048, 1024, 512, 256, 128):
        if n % cols == 0:
            return n // cols, cols
    cols = shape[-1]
    return n // cols, cols


def _pick_tile_rows(rows, cols, itemsize):
    """Row-tile size: ~_TARGET_BLOCK_BYTES per block, multiple of 8, or the
    full row extent (both satisfy the (8,128) BlockSpec rule)."""
    if rows <= 8:
        return max(rows, 1)
    t = _TARGET_BLOCK_BYTES // max(cols * itemsize, 1)
    t = (t // 8) * 8
    t = min(rows, max(8, t))
    return t


def _grl_bwd_pallas(g, coeff):
    """grad_input = -coeff * grad_output, tiled Pallas kernel."""
    if g.size == 0:
        return g

    shape, dtype = g.shape, g.dtype
    rows, cols = _fold_2d(shape)
    g2 = g.reshape(rows, cols)                      # metadata-only
    itemsize = jnp.dtype(dtype).itemsize
    tile_r = _pick_tile_rows(rows, cols, itemsize)
    grid = (pl.cdiv(rows, tile_r),)

    # Negate the scalar once, in f32, outside the kernel.
    neg_coeff = (-jnp.asarray(coeff, dtype=jnp.float32)).reshape(1)

    out = pl.pallas_call(
        _neg_scale_kernel,
        out_shape=jax.ShapeDtypeStruct((rows, cols), dtype),
        grid=grid,
        in_specs=[
            pl.BlockSpec(memory_space=pltpu.MemorySpace.SMEM),   # neg_coeff
            pl.BlockSpec((tile_r, cols), lambda i: (i, 0)),      # grad slab
        ],
        out_specs=pl.BlockSpec((tile_r, cols), lambda i: (i, 0)),
        input_output_aliases={1: 0},  # write the result in place of the grad
        compiler_params=pltpu.CompilerParams(
            dimension_semantics=("parallel",)),
    )(neg_coeff, g2)
    return out.reshape(shape)


@functools.partial(jax.custom_vjp, nondiff_argnums=(1,))
def grl(x, coeff=1.0):
    # Forward is the identity (input * 1.0): no kernel, no HBM traffic.
    return x


def _grl_vjp_fwd(x, coeff=1.0):
    return x, None


def _grl_vjp_bwd(coeff, _residuals, g):
    return (_grl_bwd_pallas(g, coeff),)


grl.defvjp(_grl_vjp_fwd, _grl_vjp_bwd)


if __name__ == "__main__":
    key = jax.random.PRNGKey(0)
    # Small NCHW-style feature map consistent with densenet1d usage.
    x = jax.random.normal(key, (2, 4, 16, 16), dtype=jnp.float32)
    coeff = 0.5

    # Forward: exact identity.
    y = grl(x, coeff)
    jax.block_until_ready(y)
    assert y.shape == x.shape and y.dtype == x.dtype
    assert bool(jnp.all(y == x))

    # Backward: grad_input = -coeff * grad_output (upstream grad here is 2.0).
    g = jax.grad(lambda a: jnp.sum(grl(a, coeff) * 2.0))(x)
    jax.block_until_ready(g)
    assert bool(jnp.allclose(g, -coeff * 2.0 * jnp.ones_like(x)))

    # Exercise the Pallas backward kernel directly on an awkward shape
    # (fallback folding path, full-array block).
    g_odd = jax.random.normal(jax.random.PRNGKey(1), (3, 5, 7), dtype=jnp.float32)
    out_odd = _grl_bwd_pallas(g_odd, 1.25)
    jax.block_until_ready(out_odd)
    assert bool(jnp.allclose(out_odd, -1.25 * g_odd, rtol=1e-6, atol=1e-6))

    print("KERNEL_OK")
</pallas_src>

<mosaic_0001>
module attributes {stable_mosaic.version = 11 : i64} {
  func.func @_neg_scale_kernel(%arg0: i32, %arg1: memref<1xf32, #tpu.memory_space<smem>>, %arg2: memref<1x2048xf32, #tpu.memory_space<vmem>>, %arg3: memref<1x2048xf32, #tpu.memory_space<vmem>>) attributes {dimension_semantics = [#tpu.dimension_semantics<parallel>], iteration_bounds = array<i64: 1>, scalar_prefetch = 0 : i64, scratch_operands = 0 : i64, tpu.core_type = #tpu.core_type<tc>, window_params = [{transform_indices = @transform_0, window_bounds = array<i64: 1>}, {transform_indices = @transform_1, window_bounds = array<i64: 1, 2048>}, {transform_indices = @transform_2, window_bounds = array<i64: 1, 2048>}]} {
    %c0 = arith.constant 0 : index
    %0 = memref.load %arg1[%c0] : memref<1xf32, #tpu.memory_space<smem>>
    %c0_0 = arith.constant 0 : index
    %c0_1 = arith.constant 0 : index
    %1 = vector.load %arg2[%c0_0, %c0_1] : memref<1x2048xf32, #tpu.memory_space<vmem>>, vector<1x2048xf32>
    %2 = vector.broadcast %0 : f32 to vector<1x2048xf32>
    %3 = arith.mulf %1, %2 : vector<1x2048xf32>
    %c0_2 = arith.constant 0 : index
    %c0_3 = arith.constant 0 : index
    %4 = vector.load %arg3[%c0_2, %c0_3] : memref<1x2048xf32, #tpu.memory_space<vmem>>, vector<1x2048xf32>
    tpu.vector_store %arg3[%c0_2, %c0_3], %3 {strides = array<i32>} : memref<1x2048xf32, #tpu.memory_space<vmem>>, vector<1x2048xf32>,
    return
  }
  func.func @transform_0(%arg0: i32) -> i32 {
    %c0_i32 = arith.constant 0 : i32
    %c0_i32_0 = arith.constant 0 : i32
    return %c0_i32 : i32
  }
  func.func @transform_1(%arg0: i32) -> (i32, i32) {
    %c0_i32 = arith.constant 0 : i32
    %c0_i32_0 = arith.constant 0 : i32
    return %arg0, %c0_i32 : i32, i32
  }
  func.func @transform_2(%arg0: i32) -> (i32, i32) {
    %c0_i32 = arith.constant 0 : i32
    %c0_i32_0 = arith.constant 0 : i32
    return %arg0, %c0_i32 : i32, i32
  }
}

</mosaic_0001>

<bundles_post_ra>
// kernel: tpu_custom_call.1
= control target key start
LH: loop header
LB: loop body
LE: loop exit
PB: predicated region body
PF: predicated region fallthrough
CT: control target
= control target key end

     0   :  { %8 = vsyncpa [#allocation4], 0  ;;  %s142_s0 = inlined_call_operand.<no memory space> [shape: f32[1], index: 0, kind: input, shape index: {}]   ;;  %s143_s1 = inlined_call_operand.hbm [shape: f32[1,2048], index: 1, kind: input, shape index: {}, may-alias: {1,2}]   ;;  %s144_s2 = inlined_call_operand.hbm [shape: f32[1,2048], index: 2, kind: output, shape index: {}, may-alias: {1,2}]  }
   0x1   :  { %9 = vsyncpa [#allocation5], 0  ;;  %s98_s9 = smov [#allocation3]   ;;  %s50_s13 = scalar_lea.hbm %s143_s1, 256 }
   0x2   :  { %s18_s10 = sshll.u32 %s98_s9, 4  ;;  %p51_p0 = scmp.ne.s32.totalorder %s143_s1, %s50_s13  ;;  %s19_s10 = int_to_ptr.vmem [resolvable:$true] %s18_s10 }
   0x3   :  { %p54_p1 = scmp.lt.u32.totalorder %s50_s13, %s143_s1 }
   0x5   :  { %p56_p2 = pnand %p54_p1, %p51_p0 }
   0x7   :  { %59 = shalt.err (!%p56_p2)
}
   0x8   :  { %s60_s18 = scalar_lea.vmem %s19_s10, 256  ;;  %p65_p4 = scmp.lt.s32.totalorder %s19_s10, %s19_s10 }
   0x9   :  { %p61_p3 = scmp.ne.s32.totalorder %s19_s10, %s60_s18  ;;  %p66_p5 = scmp.lt.s32.totalorder %s60_s18, %s60_s18 }
   0xb   :  { %p67_p6 = por %p66_p5, %p65_p4 }
   0xd   :  { %p68_p7 = pnand %p67_p6, %p61_p3 }
   0xf   :  { %71 = shalt.err (!%p68_p7)
}
  0x10   :  { %21 = dma.hbm_to_vmem [thread:$0]  %s143_s1, 256, %s19_s10, [#allocation4]  }
  0x11   :  { %94 = dma.done.wait [#allocation4], 256  }
  0x12   :  { %95 = vsyncadd [#allocation4], 4294967040  ;;  %v28_v0 = vstv %s142_s0  ;;  %s99_s23 = smov [#allocation6]   ;;  %v26_v1 = vld [vmem:[#allocation3] sm:$0xff]  ;;  %v27_v2 = vld [vmem:[#allocation3 + $0x8] sm:$0xff] }
  0x13   :  { %s39_s24 = sshll.u32 %s99_s23, 4  ;;  %v29_v3 = vmul.f32 %v28_v0, %v26_v1  ;;  %v30_v4 = vmul.f32 %v28_v0, %v27_v2  ;;  %s40_s24 = int_to_ptr.vmem [resolvable:$true] %s39_s24 }
  0x14   :  { %s72_s25 = scalar_lea.vmem %s40_s24, 256  ;;  %p77_p9 = scmp.lt.s32.totalorder %s40_s24, %s40_s24 }
  0x15   :  { %31 = vst [vmem:[#allocation6] sm:$0xff] %v29_v3  ;;  %32 = vst [vmem:[#allocation6 + $0x8] sm:$0xff] %v30_v4  ;;  %p73_p8 = scmp.ne.s32.totalorder %s40_s24, %s72_s25  ;;  %p78_p10 = scmp.lt.s32.totalorder %s72_s25, %s72_s25 }
  0x17   :  { %p79_p11 = por %p78_p10, %p77_p9 }
  0x19   :  { %p80_p12 = pnand %p79_p11, %p73_p8 }
  0x1b   :  { %83 = shalt.err (!%p80_p12)
}
  0x1c   :  { %s84_s0 = scalar_lea.hbm %s144_s2, 256 }
  0x1d   :  { %p85_p13 = scmp.ne.s32.totalorder %s144_s2, %s84_s0  ;;  %p88_p0 = scmp.lt.u32.totalorder %s84_s0, %s144_s2 }
  0x1f   :  { %p90_p1 = pnand %p88_p0, %p85_p13 }
  0x21   :  { %93 = shalt.err (!%p90_p1)
}
  0x22   :  { %42 = dma.vmem_to_hbm [thread:$0]  %s40_s24, 256, %s144_s2, [#allocation5]  }
  0x23   :  { %96 = dma.done.wait [#allocation5], 256  }
  0x24   :  { %97 = vsyncadd [#allocation5], 4294967040 }
  0x25   :  { %46 = vsyncpa [#allocation4], 1 }
  0x26   :  { %47 = vsyncpa [#allocation5], 1 }

</bundles_post_ra>
